<compile_context>
chip_gen: v6e
topology: v6e:2x2x1
jax: 0.10.0
libtpu: 0.0.40
codegen_flags: <defaults>
</compile_context>

<pallas_src>
import jax
import jax.numpy as jnp
from jax.experimental import pallas as pl
from jax.experimental.pallas import tpu as pltpu


def _round_up(x, m):
    return ((x + m - 1) // m) * m


# ----------------------------- Pallas kernel ------------------------------ #
def _output_kernel(q2_ref, q3_ref, off2_ref, off3_ref, lens_ref,
                   cf_ref, cands_ref, out_fix_ref, out_ent_ref):
    """One batch tile (TB rows) per grid step.

    q2_ref    : (TB, H)        folded query (2-D view, fixed head)
    q3_ref    : (TB, 1, H)     folded query (3-D view, entity head)
    off2_ref  : (TB, 1)        k . bv
    off3_ref  : (TB, 1, 1)     k . bv
    lens_ref  : (TB, 1, 1)     int32 valid-candidate counts
    cf_ref    : (H, NPf)       fixed candidates^T (shared, VMEM-resident)
    cands_ref : (TB, NPe, H)   per-batch entity candidates (N padded to 128)
    out_fix_ref : (TB, NPf)    fixed-arg logits   (lane-dense)
    out_ent_ref : (TB, 1, NPe) entity-arg logits  (lane-dense)
    """
    # ---- Fixed-argument head: one lane-dense MXU matmul per tile ----
    s_fix = jnp.dot(q2_ref[...], cf_ref[...],
                    preferred_element_type=jnp.float32) + off2_ref[...]
    out_fix_ref[...] = jnp.maximum(s_fix, 0.0)

    # ---- Entity head: batched MXU contraction over H (flash-attn pattern) ----
    s_ent = jnp.einsum('bqh,bnh->bqn', q3_ref[...], cands_ref[...],
                       preferred_element_type=jnp.float32) + off3_ref[...]
    logits = jnp.maximum(s_ent, 0.0)
    tb, _, npe = logits.shape
    idx = jax.lax.broadcasted_iota(jnp.int32, (tb, 1, npe), 2)
    out_ent_ref[...] = jnp.where(idx >= lens_ref[...], 0.0, logits)


# ------------------------------ JAX wrapper -------------------------------- #
def output_heads(obs, cands_ent, lens_ent, cands_fixed, params, *, tb_max=256):
    """Fused forward of both DiscreteAction heads.

    obs         : (B, H) f32
    cands_ent   : (B, N_ent, H) f32      lookup['Entity']
    lens_ent    : (B,) int               lookup['N']
    cands_fixed : (n_fix, H) f32         self.arg.weight[idxs]  (shared, no batch copy)
    returns (logits_fixed (B, n_fix), logits_ent (B, N_ent)) float32
    """
    obs = obs.astype(jnp.float32)
    cands_ent = cands_ent.astype(jnp.float32)
    cands_fixed = cands_fixed.astype(jnp.float32)

    B, H = obs.shape
    N_ent = cands_ent.shape[1]
    n_fix = cands_fixed.shape[0]

    NPe = _round_up(max(N_ent, 1), 128)      # lane-dense entity logits
    NPf = _round_up(max(n_fix, 1), 128)      # lane-dense fixed logits

    # Batch tile: multiple of 8 sublanes, capped so the double-buffered per-row
    # VMEM footprint (candidate tile + padded small blocks) fits comfortably.
    per_row_bytes = 4 * (NPe * H + 8 * NPe + 3 * 8 * 128 + NPf + 2 * 128)
    budget = 16 * 1024 * 1024
    tb_cap = max(8, (budget // (2 * per_row_bytes)) // 8 * 8)
    TB = max(8, min(tb_max, tb_cap, _round_up(B, 8)))
    B_pad = _round_up(B, TB)

    # --- fold the value projection into the query (tiny (B,H)x(H,H) work) ---
    wk = params["wk"].astype(jnp.float32)    # (H, H)  (out, in)
    bk = params["bk"].astype(jnp.float32)    # (H,)
    wv = params["wv"].astype(jnp.float32)    # (H, H)  (out, in)
    bv = params["bv"].astype(jnp.float32)    # (H,)

    k = obs @ wk.T + bk[None, :]             # (B, H)
    q = k @ wv                               # (B, H):  q . c == k . (c @ Wv^T)
    off = k @ bv[:, None]                    # (B, 1):  k . bv

    # --- pad batch / candidate axes to tile boundaries ---
    q_p = jnp.zeros((B_pad, H), jnp.float32).at[:B].set(q)
    off_p = jnp.zeros((B_pad, 1), jnp.float32).at[:B].set(off)
    lens_p = jnp.zeros((B_pad,), jnp.int32).at[:B].set(lens_ent.astype(jnp.int32))
    cands_p = jnp.zeros((B_pad, NPe, H), jnp.float32).at[:B, :N_ent].set(cands_ent)
    cf_t = jnp.zeros((H, NPf), jnp.float32).at[:, :n_fix].set(cands_fixed.T)

    grid = (B_pad // TB,)

    out_fix, out_ent = pl.pallas_call(
        _output_kernel,
        out_shape=(jax.ShapeDtypeStruct((B_pad, NPf), jnp.float32),
                   jax.ShapeDtypeStruct((B_pad, 1, NPe), jnp.float32)),
        grid=grid,
        in_specs=[
            pl.BlockSpec((TB, H), lambda i: (i, 0)),           # q (2-D view)
            pl.BlockSpec((TB, 1, H), lambda i: (i, 0, 0)),     # q (3-D view)
            pl.BlockSpec((TB, 1), lambda i: (i, 0)),           # off (2-D view)
            pl.BlockSpec((TB, 1, 1), lambda i: (i, 0, 0)),     # off (3-D view)
            pl.BlockSpec((TB, 1, 1), lambda i: (i, 0, 0)),     # lens
            pl.BlockSpec((H, NPf), lambda i: (0, 0)),          # fixed cands^T (resident)
            pl.BlockSpec((TB, NPe, H), lambda i: (i, 0, 0)),   # entity cands
        ],
        out_specs=[
            pl.BlockSpec((TB, NPf), lambda i: (i, 0)),         # fixed logits
            pl.BlockSpec((TB, 1, NPe), lambda i: (i, 0, 0)),   # entity logits
        ],
        compiler_params=pltpu.CompilerParams(
            dimension_semantics=("parallel",),
            vmem_limit_bytes=32 * 1024 * 1024),
    )(q_p, q_p.reshape(B_pad, 1, H), off_p, off_p.reshape(B_pad, 1, 1),
      lens_p.reshape(B_pad, 1, 1), cf_t, cands_p)

    return out_fix[:B, :n_fix], out_ent.reshape(B_pad, NPe)[:B, :N_ent]


def output_forward(obs, lookup_entity, lookup_n, params, fixed_idxs):
    """Output.forward: logits for each (action, arg) pair.

    obs           : (B, H)        fixed-size observation embedding
    lookup_entity : (B, N_ent, H) per-entity embeddings (lookup['Entity'])
    lookup_n      : (B,) int32    number of valid entities (lookup['N'])
    """
    # Fixed argType candidates are shared embedding rows -- NOT broadcast over batch.
    cands_fixed = params["arg_embed"][fixed_idxs]            # (n_fix, H)
    logits_fixed, logits_entity = output_heads(
        obs, lookup_entity, lookup_n, cands_fixed, params)
    return {"Action": {"FixedArg": logits_fixed, "EntityArg": logits_entity}}


# --------------------------- reference (plain JAX) -------------------------- #
def _dot_relu_ref(obs, cands, lens, params):
    k = obs @ params["wk"].T + params["bk"]                  # (B, H)
    v = cands @ params["wv"].T + params["bv"]                # (B, N, H)
    x = jnp.maximum(jnp.sum(k[:, None, :] * v, -1), 0.0)     # (B, N)
    if lens is not None:
        idx = jnp.arange(x.shape[-1])[None, :]
        x = jnp.where(idx >= lens[:, None], 0.0, x)
    return x


# ---------------------------------- main ----------------------------------- #
if __name__ == "__main__":
    H = 32                   # config.HIDDEN
    ACTION_N = 8             # Action.n (embedding rows)
    FIXED_IDXS = jnp.array([0, 1, 2, 3], dtype=jnp.int32)    # arg.edges -> e.idx

    key = jax.random.PRNGKey(0)
    (k_wk, k_bk, k_wv, k_bv, k_emb,
     k_obs, k_ent, k_obs2, k_ent2, k_len2) = jax.random.split(key, 10)
    scale = 1.0 / jnp.sqrt(H)
    params = {
        "wk": jax.random.uniform(k_wk, (H, H), jnp.float32, -scale, scale),
        "bk": jax.random.uniform(k_bk, (H,), jnp.float32, -scale, scale),
        "wv": jax.random.uniform(k_wv, (H, H), jnp.float32, -scale, scale),
        "bv": jax.random.uniform(k_bv, (H,), jnp.float32, -scale, scale),
        "arg_embed": jax.random.normal(k_emb, (ACTION_N, H), jnp.float32),
    }

    def check(obs, lookup_entity, lookup_n):
        rets = output_forward(obs, lookup_entity, lookup_n, params, FIXED_IDXS)
        jax.block_until_ready(rets)
        B = obs.shape[0]
        cands_fixed = jnp.broadcast_to(params["arg_embed"][FIXED_IDXS][None],
                                       (B, FIXED_IDXS.shape[0], H))
        ref_fixed = _dot_relu_ref(obs, cands_fixed, None, params)
        ref_ent = _dot_relu_ref(obs, lookup_entity, lookup_n, params)
        assert jnp.allclose(rets["Action"]["FixedArg"], ref_fixed,
                            atol=1e-4, rtol=1e-4)
        assert jnp.allclose(rets["Action"]["EntityArg"], ref_ent,
                            atol=1e-4, rtol=1e-4)

    # case 1: original small shapes
    B, N_ENT = 2, 8
    obs = jax.random.normal(k_obs, (B, H), jnp.float32)
    lookup_entity = jax.random.normal(k_ent, (B, N_ENT, H), jnp.float32)
    lookup_n = jnp.array([5, 3], dtype=jnp.int32)
    check(obs, lookup_entity, lookup_n)

    # case 2: odd sizes to exercise batch/candidate padding and slicing
    B2, N_ENT2 = 20, 13
    obs2 = jax.random.normal(k_obs2, (B2, H), jnp.float32)
    lookup_entity2 = jax.random.normal(k_ent2, (B2, N_ENT2, H), jnp.float32)
    lookup_n2 = jax.random.randint(k_len2, (B2,), 0, N_ENT2 + 1, dtype=jnp.int32)
    check(obs2, lookup_entity2, lookup_n2)

    print("KERNEL_OK")
</pallas_src>

<mosaic_0001>
module attributes {stable_mosaic.version = 11 : i64} {
  func.func @_output_kernel(%arg0: i32, %arg1: memref<8x32xf32, #tpu.memory_space<vmem>>, %arg2: memref<8x1x32xf32, #tpu.memory_space<vmem>>, %arg3: memref<8x1xf32, #tpu.memory_space<vmem>>, %arg4: memref<8x1x1xf32, #tpu.memory_space<vmem>>, %arg5: memref<8x1x1xi32, #tpu.memory_space<vmem>>, %arg6: memref<32x128xf32, #tpu.memory_space<vmem>>, %arg7: memref<8x128x32xf32, #tpu.memory_space<vmem>>, %arg8: memref<8x128xf32, #tpu.memory_space<vmem>>, %arg9: memref<8x1x128xf32, #tpu.memory_space<vmem>>) attributes {dimension_semantics = [#tpu.dimension_semantics<parallel>], iteration_bounds = array<i64: 1>, scalar_prefetch = 0 : i64, scratch_operands = 0 : i64, tpu.core_type = #tpu.core_type<tc>, window_params = [{transform_indices = @transform_0, window_bounds = array<i64: 8, 32>}, {transform_indices = @transform_1, window_bounds = array<i64: 8, 1, 32>}, {transform_indices = @transform_2, window_bounds = array<i64: 8, 1>}, {transform_indices = @transform_3, window_bounds = array<i64: 8, 1, 1>}, {transform_indices = @transform_4, window_bounds = array<i64: 8, 1, 1>}, {pipeline_mode = #tpu.pipeline_mode<synchronous>, transform_indices = @transform_5, window_bounds = array<i64: 32, 128>}, {transform_indices = @transform_6, window_bounds = array<i64: 8, 128, 32>}, {transform_indices = @transform_7, window_bounds = array<i64: 8, 128>}, {transform_indices = @transform_8, window_bounds = array<i64: 8, 1, 128>}]} {
    %c0 = arith.constant 0 : index
    %c0_0 = arith.constant 0 : index
    %0 = vector.load %arg1[%c0, %c0_0] : memref<8x32xf32, #tpu.memory_space<vmem>>, vector<8x32xf32>
    %c0_1 = arith.constant 0 : index
    %c0_2 = arith.constant 0 : index
    %1 = vector.load %arg6[%c0_1, %c0_2] : memref<32x128xf32, #tpu.memory_space<vmem>>, vector<32x128xf32>
    %cst = arith.constant dense<0.000000e+00> : vector<8x128xf32>
    %2 = tpu.matmul %0, %1, %cst {dimension_numbers = #tpu.dot_dimension_numbers<[1], [0], [0], [1], [0, 0, 1, 1], [], []>} : vector<8x32xf32>, vector<32x128xf32>, vector<8x128xf32> -> vector<8x128xf32>
    %c0_3 = arith.constant 0 : index
    %c0_4 = arith.constant 0 : index
    %3 = vector.load %arg3[%c0_3, %c0_4] : memref<8x1xf32, #tpu.memory_space<vmem>>, vector<8x1xf32>
    %4 = vector.broadcast %3 : vector<8x1xf32> to vector<8x128xf32>
    %5 = arith.addf %2, %4 : vector<8x128xf32>
    %cst_5 = arith.constant 0.000000e+00 : f32
    %6 = vector.broadcast %cst_5 : f32 to vector<8x128xf32>
    %7 = arith.maximumf %5, %6 : vector<8x128xf32>
    %c0_6 = arith.constant 0 : index
    %c0_7 = arith.constant 0 : index
    %8 = vector.load %arg8[%c0_6, %c0_7] : memref<8x128xf32, #tpu.memory_space<vmem>>, vector<8x128xf32>
    tpu.vector_store %arg8[%c0_6, %c0_7], %7 {strides = array<i32>} : memref<8x128xf32, #tpu.memory_space<vmem>>, vector<8x128xf32>,
    %c0_8 = arith.constant 0 : index
    %c0_9 = arith.constant 0 : index
    %c0_10 = arith.constant 0 : index
    %9 = vector.load %arg2[%c0_8, %c0_9, %c0_10] : memref<8x1x32xf32, #tpu.memory_space<vmem>>, vector<8x1x32xf32>
    %c0_11 = arith.constant 0 : index
    %c0_12 = arith.constant 0 : index
    %c0_13 = arith.constant 0 : index
    %10 = vector.load %arg7[%c0_11, %c0_12, %c0_13] : memref<8x128x32xf32, #tpu.memory_space<vmem>>, vector<8x128x32xf32>
    "tpu.trace_start"() <{level = 10 : i32, message = "bqh,bnh->bqn"}> : () -> ()
    %cst_14 = arith.constant dense<0.000000e+00> : vector<8x1x128xf32>
    %11 = tpu.matmul %9, %10, %cst_14 {dimension_numbers = #tpu.dot_dimension_numbers<[2], [2], [1], [1], [0, 0, 0, 1, 1, 1], [0], [0]>} : vector<8x1x32xf32>, vector<8x128x32xf32>, vector<8x1x128xf32> -> vector<8x1x128xf32>
    "tpu.trace_stop"() : () -> ()
    %c0_15 = arith.constant 0 : index
    %c0_16 = arith.constant 0 : index
    %c0_17 = arith.constant 0 : index
    %12 = vector.load %arg4[%c0_15, %c0_16, %c0_17] : memref<8x1x1xf32, #tpu.memory_space<vmem>>, vector<8x1x1xf32>
    %13 = vector.broadcast %12 : vector<8x1x1xf32> to vector<8x1x128xf32>
    %14 = arith.addf %11, %13 : vector<8x1x128xf32>
    %cst_18 = arith.constant 0.000000e+00 : f32
    %15 = vector.broadcast %cst_18 : f32 to vector<8x1x128xf32>
    %16 = arith.maximumf %14, %15 : vector<8x1x128xf32>
    %17 = tpu.iota {dimensions = array<i32: 2>} : vector<8x1x128xi32>
    %c0_19 = arith.constant 0 : index
    %c0_20 = arith.constant 0 : index
    %c0_21 = arith.constant 0 : index
    %18 = vector.load %arg5[%c0_19, %c0_20, %c0_21] : memref<8x1x1xi32, #tpu.memory_space<vmem>>, vector<8x1x1xi32>
    %19 = vector.broadcast %18 : vector<8x1x1xi32> to vector<8x1x128xi32>
    %20 = arith.cmpi sge, %17, %19 : vector<8x1x128xi32>
    %cst_22 = arith.constant 0.000000e+00 : f32
    %21 = vector.broadcast %cst_22 : f32 to vector<8x1x128xf32>
    %22 = arith.select %20, %21, %16 : vector<8x1x128xi1>, vector<8x1x128xf32>
    %c0_23 = arith.constant 0 : index
    %c0_24 = arith.constant 0 : index
    %c0_25 = arith.constant 0 : index
    %23 = vector.load %arg9[%c0_23, %c0_24, %c0_25] : memref<8x1x128xf32, #tpu.memory_space<vmem>>, vector<8x1x128xf32>
    tpu.vector_store %arg9[%c0_23, %c0_24, %c0_25], %22 {strides = array<i32>} : memref<8x1x128xf32, #tpu.memory_space<vmem>>, vector<8x1x128xf32>,
    return
  }
  func.func @transform_0(%arg0: i32) -> (i32, i32) {
    %c0_i32 = arith.constant 0 : i32
    %c0_i32_0 = arith.constant 0 : i32
    return %arg0, %c0_i32 : i32, i32
  }
  func.func @transform_1(%arg0: i32) -> (i32, i32, i32) {
    %c0_i32 = arith.constant 0 : i32
    %c0_i32_0 = arith.constant 0 : i32
    %c0_i32_1 = arith.constant 0 : i32
    return %arg0, %c0_i32, %c0_i32_0 : i32, i32, i32
  }
  func.func @transform_2(%arg0: i32) -> (i32, i32) {
    %c0_i32 = arith.constant 0 : i32
    %c0_i32_0 = arith.constant 0 : i32
    return %arg0, %c0_i32 : i32, i32
  }
  func.func @transform_3(%arg0: i32) -> (i32, i32, i32) {
    %c0_i32 = arith.constant 0 : i32
    %c0_i32_0 = arith.constant 0 : i32
    %c0_i32_1 = arith.constant 0 : i32
    return %arg0, %c0_i32, %c0_i32_0 : i32, i32, i32
  }
  func.func @transform_4(%arg0: i32) -> (i32, i32, i32) {
    %c0_i32 = arith.constant 0 : i32
    %c0_i32_0 = arith.constant 0 : i32
    %c0_i32_1 = arith.constant 0 : i32
    return %arg0, %c0_i32, %c0_i32_0 : i32, i32, i32
  }
  func.func @transform_5(%arg0: i32) -> (i32, i32) {
    %c0_i32 = arith.constant 0 : i32
    %c0_i32_0 = arith.constant 0 : i32
    %c0_i32_1 = arith.constant 0 : i32
    return %c0_i32, %c0_i32_0 : i32, i32
  }
  func.func @transform_6(%arg0: i32) -> (i32, i32, i32) {
    %c0_i32 = arith.constant 0 : i32
    %c0_i32_0 = arith.constant 0 : i32
    %c0_i32_1 = arith.constant 0 : i32
    return %arg0, %c0_i32, %c0_i32_0 : i32, i32, i32
  }
  func.func @transform_7(%arg0: i32) -> (i32, i32) {
    %c0_i32 = arith.constant 0 : i32
    %c0_i32_0 = arith.constant 0 : i32
    return %arg0, %c0_i32 : i32, i32
  }
  func.func @transform_8(%arg0: i32) -> (i32, i32, i32) {
    %c0_i32 = arith.constant 0 : i32
    %c0_i32_0 = arith.constant 0 : i32
    %c0_i32_1 = arith.constant 0 : i32
    return %arg0, %c0_i32, %c0_i32_0 : i32, i32, i32
  }
}

</mosaic_0001>

<bundles_post_ra>
// kernel: tpu_custom_call.1
= control target key start
LH: loop header
LB: loop body
LE: loop exit
PB: predicated region body
PF: predicated region fallthrough
CT: control target
= control target key end

     0   :  { %14 = vsyncpa [#allocation3], 0  ;;  %vm41_vm0 = vcmask 261120   ;;  %v2051_v2 = vmov 0.0   ;;  %vm2052_vm1 = vmmov 0   ;;  %v2053_v7 = vmov 0   ;;  %s2922_s0 = inlined_call_operand.vmem [shape: f32[8,32], index: 0, kind: input, shape index: {}]   ;;  %s2923_s1 = inlined_call_operand.vmem [shape: f32[8,1,32], index: 1, kind: input, shape index: {}]   ;;  %s2924_s2 = inlined_call_operand.vmem [shape: f32[8,1], index: 2, kind: input, shape index: {}]   ;;  %s2925_s3 = inlined_call_operand.vmem [shape: f32[8,1,1], index: 3, kind: input, shape index: {}]   ;;  %s2926_s4 = inlined_call_operand.vmem [shape: s32[8,1,1], index: 4, kind: input, shape index: {}]   ;;  %s2927_s5 = inlined_call_operand.vmem [shape: f32[32,128], index: 5, kind: input, shape index: {}]   ;;  %s2928_s6 = inlined_call_operand.vmem [shape: f32[8,128,32], index: 6, kind: input, shape index: {}]   ;;  %s2929_s7 = inlined_call_operand.hbm [shape: f32[8,128], index: 7, kind: output, shape index: {0}]   ;;  %s2930_s8 = inlined_call_operand.hbm [shape: f32[8,1,128], index: 8, kind: output, shape index: {1}]  }
   0x1   :  { %v34_v0 = vld [vmem:[%s2927_s5 + $0x18] sm:$0xff]  ;;  %1707 = vmatprep.subr.mxu0 %v2051_v2  ;;  %1718 = vmatprep.subr.mxu1 %v2051_v2  ;;  %v33_v3 = vld [vmem:[%s2927_s5 + $0x10] sm:$0xff]  ;;  %v32_v4 = vld [vmem:[%s2927_s5 + $0x8] sm:$0xff] }
   0x2   :  { %v140_v1 = vld [vmem:[%s2928_s6 + $0x78] sm:$0xff]  ;;  %1708 = vmatpush3.msra.mxu0 %v34_v0  ;;  %v139_v5 = vld [vmem:[%s2928_s6 + $0x70] sm:$0xff]  ;;  %1715 = vmatprep.mubr.msk.f32.mxu0 %vm2052_vm1, %v2051_v2  ;;  %v31_v6 = vld [vmem:[%s2927_s5] sm:$0xff] }
   0x3   :  { %1719 = vmatpush3.xpose.msk.msra.mxu1 %vm41_vm0, %v140_v1  ;;  %1709 = vmatprep.subr.mxu0 %v2051_v2  ;;  %v30_v8 = vld [vmem:[%s2922_s0] sm:$0xff]  ;;  %v138_v9 = vld [vmem:[%s2928_s6 + $0x68] sm:$0xff]  ;;  %v156_v10 = vld [vmem:[%s2928_s6 + $0xf8] sm:$0xff] }
   0x4   :  { %1720 = vmatprep.subr.mxu1 %v2051_v2  ;;  %1710 = vmatpush3.msra.mxu0 %v33_v3  ;;  %v137_v11 = vld [vmem:[%s2928_s6 + $0x60] sm:$0xff]  ;;  %v155_v12 = vld [vmem:[%s2928_s6 + $0xf0] sm:$0xff]  ;;  %v136_v15 = vld [vmem:[%s2928_s6 + $0x58] sm:$0xff] }
   0x5   :  { %1711 = vmatprep.subr.mxu0 %v2051_v2  ;;  %2005 = vset.pattern.permute.xlu0 %v2053_v7  ;;  %v253_v13 = vld [vmem:[%s2925_s3] sm:$0x1]  ;;  %v254_v14 = vld [vmem:[%s2925_s3 + $0x1] sm:$0x1]  ;;  %v154_v16 = vld [vmem:[%s2928_s6 + $0xe8] sm:$0xff] }
   0x6   :  { %1712 = vmatpush3.msra.mxu0 %v32_v4  ;;  %1750 = vmatprep.mubr.msk.f32.mxu1 %vm2052_vm1, %v2051_v2  ;;  %v257_v17 = vld [vmem:[%s2925_s3 + $0x4] sm:$0x1]  ;;  %v135_v18 = vld [vmem:[%s2928_s6 + $0x50] sm:$0xff]  ;;  %v259_v20 = vld [vmem:[%s2925_s3 + $0x6] sm:$0x1] }
   0x7   :  { %1721 = vmatpush3.xpose.msk.msra.mxu1 %vm41_vm0, %v139_v5  ;;  %1713 = vmatprep.subr.mxu0 %v2051_v2  ;;  %v153_v19 = vld [vmem:[%s2928_s6 + $0xe0] sm:$0xff]  ;;  %v134_v21 = vld [vmem:[%s2928_s6 + $0x48] sm:$0xff]  ;;  %v152_v22 = vld [vmem:[%s2928_s6 + $0xd8] sm:$0xff] }
   0x8   :  { %1722 = vmatprep.subr.mxu1 %v2051_v2  ;;  %1714 = vmatpush3.msra.mxu0 %v31_v6  ;;  %v255_v23 = vld [vmem:[%s2925_s3 + $0x2] sm:$0x1]  ;;  %v256_v25 = vld [vmem:[%s2925_s3 + $0x3] sm:$0x1]  ;;  %v151_v27 = vld [vmem:[%s2928_s6 + $0xd0] sm:$0xff] }
   0x9   :  { %1716 = vmatmul.mubr.msk.f32.vlgmr.msra.gmra.mxu0 %vm41_vm0, %v30_v8  ;;  %1753 = vmatprep.subr.mxu0 %v2051_v2  ;;  %v35_v24 = vld [vmem:[%s2924_s2] sm:$0xff]  ;;  %v132_v30 = vld [vmem:[%s2928_s6 + $0x38] sm:$0xff]  ;;  %v150_v31 = vld [vmem:[%s2928_s6 + $0xc8] sm:$0xff] }
   0xa   :  { %1754 = vmatpush3.xpose.msk.msra.mxu0 %vm41_vm0, %v156_v10  ;;  %263 = vperm.xlu0 %2005, %v253_v13   ;;  %v133_v26 = vld [vmem:[%s2928_s6 + $0x40] sm:$0xff] }
   0xb   :  { %1723 = vmatpush3.xpose.msk.msra.mxu1 %vm41_vm0, %v138_v9  ;;  %1755 = vmatprep.subr.mxu0 %v2051_v2  ;;  %v1312_v28 = vld [vmem:[%s2926_s4 + $0x1] sm:$0x1]  ;;  %v258_v29 = vld [vmem:[%s2925_s3 + $0x5] sm:$0x1] }
   0xc   :  { %1724 = vmatprep.subr.mxu1 %v2051_v2  ;;  %1785 = vmatprep.mubr.msk.f32.mxu0 %vm2052_vm1, %v2051_v2 }
   0xd   :  { %2006 = vset.pattern.permute.xlu1 %v2053_v7 }
   0xe   :  { %1756 = vmatpush3.xpose.msk.msra.mxu0 %vm41_vm0, %v155_v12  ;;  %272 = vperm.xlu0 %2005, %v254_v14  }
   0xf   :  { %1725 = vmatpush3.xpose.msk.msra.mxu1 %vm41_vm0, %v137_v11  ;;  %1757 = vmatprep.subr.mxu0 %v2051_v2 }
  0x10   :  { %1726 = vmatprep.subr.mxu1 %v2051_v2  ;;  %281 = vperm.xlu1 %2006, %v255_v23  }
  0x12   :  { %1758 = vmatpush3.xpose.msk.msra.mxu0 %vm41_vm0, %v154_v16  ;;  %299 = vperm.xlu0 %2005, %v257_v17  }
  0x13   :  { %1727 = vmatpush3.xpose.msk.msra.mxu1 %vm41_vm0, %v136_v15  ;;  %1759 = vmatprep.subr.mxu0 %v2051_v2 }
  0x14   :  { %1728 = vmatprep.subr.mxu1 %v2051_v2  ;;  %290 = vperm.xlu1 %2006, %v256_v25  }
  0x16   :  { %1760 = vmatpush3.xpose.msk.msra.mxu0 %vm41_vm0, %v153_v19  ;;  %317 = vperm.xlu0 %2005, %v259_v20  }
  0x17   :  { %1729 = vmatpush3.xpose.msk.msra.mxu1 %vm41_vm0, %v135_v18  ;;  %1761 = vmatprep.subr.mxu0 %v2051_v2 }
  0x18   :  { %1730 = vmatprep.subr.mxu1 %v2051_v2  ;;  %308 = vperm.xlu1 %2006, %v258_v29  }
  0x1a   :  { %1762 = vmatpush3.xpose.msk.msra.mxu0 %vm41_vm0, %v152_v22  ;;  %38 = vperm.xlu0 %2005, %v35_v24  }
  0x1b   :  { %1731 = vmatpush3.xpose.msk.msra.mxu1 %vm41_vm0, %v134_v21  ;;  %1763 = vmatprep.subr.mxu0 %v2051_v2 }
  0x1c   :  { %1732 = vmatprep.subr.mxu1 %v2051_v2 }
  0x1e   :  { %1764 = vmatpush3.xpose.msk.msra.mxu0 %vm41_vm0, %v151_v27  ;;  %1327 = vperm.xlu0 %2005, %v1312_v28  }
  0x1f   :  { %1733 = vmatpush3.xpose.msk.msra.mxu1 %vm41_vm0, %v133_v26  ;;  %1765 = vmatprep.subr.mxu0 %v2051_v2 }
  0x20   :  { %1734 = vmatprep.subr.mxu1 %v2051_v2 }
  0x21   :  { %15 = vsyncpa [#allocation5], 0  ;;  %v260_v32 = vld [vmem:[%s2925_s3 + $0x7] sm:$0x1]  ;;  %v131_v33 = vld [vmem:[%s2928_s6 + $0x30] sm:$0xff] }
  0x22   :  { %1766 = vmatpush3.xpose.msk.msra.mxu0 %vm41_vm0, %v150_v31  ;;  %v149_v34 = vld [vmem:[%s2928_s6 + $0xc0] sm:$0xff]  ;;  %326 = vperm.xlu1 %2006, %v260_v32   ;;  %v130_v36 = vld [vmem:[%s2928_s6 + $0x28] sm:$0xff]  ;;  %v148_v37 = vld [vmem:[%s2928_s6 + $0xb8] sm:$0xff] }
  0x23   :  { %1735 = vmatpush3.xpose.msk.msra.mxu1 %vm41_vm0, %v132_v30  ;;  %1767 = vmatprep.subr.mxu0 %v2051_v2  ;;  %v1311_v35 = vld [vmem:[%s2926_s4] sm:$0x1]  ;;  %v147_v39 = vld [vmem:[%s2928_s6 + $0xb0] sm:$0xff]  ;;  %v128_v40 = vld [vmem:[%s2928_s6 + $0x18] sm:$0xff] }
  0x24   :  { %1736 = vmatprep.subr.mxu1 %v2051_v2  ;;  %v129_v38 = vld [vmem:[%s2928_s6 + $0x20] sm:$0xff]  ;;  %v146_v41 = vld [vmem:[%s2928_s6 + $0xa8] sm:$0xff]  ;;  %v127_v42 = vld [vmem:[%s2928_s6 + $0x10] sm:$0xff] }
  0x25   :  { %v145_v43 = vld [vmem:[%s2928_s6 + $0xa0] sm:$0xff]  ;;  %v126_v44 = vld [vmem:[%s2928_s6 + $0x8] sm:$0xff]  ;;  %v144_v45 = vld [vmem:[%s2928_s6 + $0x98] sm:$0xff] }
  0x26   :  { %1768 = vmatpush3.xpose.msk.msra.mxu0 %vm41_vm0, %v149_v34  ;;  %1320 = vperm.xlu1 %2006, %v1311_v35   ;;  %v125_v46 = vld [vmem:[%s2928_s6] sm:$0xff]  ;;  %v143_v47 = vld [vmem:[%s2928_s6 + $0x90] sm:$0xff]  ;;  %v142_v49 = vld [vmem:[%s2928_s6 + $0x88] sm:$0xff] }
  0x27   :  { %1737 = vmatpush3.xpose.msk.msra.mxu1 %vm41_vm0, %v131_v33  ;;  %1769 = vmatprep.subr.mxu0 %v2051_v2  ;;  %v117_v48 = vld [vmem:[%s2923_s1] sm:$0x1]  ;;  %v172_v50 = vld [vmem:[%s2928_s6 + $0x178] sm:$0xff]  ;;  %v171_v52 = vld [vmem:[%s2928_s6 + $0x170] sm:$0xff] }
  0x28   :  { %1738 = vmatprep.subr.mxu1 %v2051_v2  ;;  %v141_v51 = vld [vmem:[%s2928_s6 + $0x80] sm:$0xff]  ;;  %v170_v54 = vld [vmem:[%s2928_s6 + $0x168] sm:$0xff]  ;;  %v188_v55 = vld [vmem:[%s2928_s6 + $0x1f8] sm:$0xff] }
  0x29   :  { %v118_v53 = vld [vmem:[%s2923_s1 + $0x1] sm:$0x1]  ;;  %v187_v57 = vld [vmem:[%s2928_s6 + $0x1f0] sm:$0xff]  ;;  %v1313_v58 = vld [vmem:[%s2926_s4 + $0x2] sm:$0x1] }
  0x2a   :  { %1770 = vmatpush3.xpose.msk.msra.mxu0 %vm41_vm0, %v148_v37  ;;  %v169_v56 = vld [vmem:[%s2928_s6 + $0x160] sm:$0xff]  ;;  %v168_v60 = vld [vmem:[%s2928_s6 + $0x158] sm:$0xff]  ;;  %v186_v61 = vld [vmem:[%s2928_s6 + $0x1e8] sm:$0xff]  ;;  %1334 = vperm.xlu1 %2006, %v1313_v58  }
  0x2b   :  { %1739 = vmatpush3.xpose.msk.msra.mxu1 %vm41_vm0, %v130_v36  ;;  %1771 = vmatprep.subr.mxu0 %v2051_v2  ;;  %v1314_v59 = vld [vmem:[%s2926_s4 + $0x3] sm:$0x1]  ;;  %v167_v62 = vld [vmem:[%s2928_s6 + $0x150] sm:$0xff]  ;;  %v166_v0 = vld [vmem:[%s2928_s6 + $0x148] sm:$0xff] }
  0x2c   :  { %1740 = vmatprep.subr.mxu1 %v2051_v2  ;;  %1341 = vperm.xlu0 %2005, %v1314_v59   ;;  %v185_v63 = vld [vmem:[%s2928_s6 + $0x1e0] sm:$0xff]  ;;  %v184_v1 = vld [vmem:[%s2928_s6 + $0x1d8] sm:$0xff]  ;;  %v183_v4 = vld [vmem:[%s2928_s6 + $0x1d0] sm:$0xff] }
  0x2d   :  { %v165_v3 = vld [vmem:[%s2928_s6 + $0x140] sm:$0xff]  ;;  %v164_v5 = vld [vmem:[%s2928_s6 + $0x138] sm:$0xff]  ;;  %v182_v6 = vld [vmem:[%s2928_s6 + $0x1c8] sm:$0xff] }
  0x2e   :  { %1772 = vmatpush3.xpose.msk.msra.mxu0 %vm41_vm0, %v147_v39  ;;  %v163_v7 = vld [vmem:[%s2928_s6 + $0x130] sm:$0xff]  ;;  %v181_v8 = vld [vmem:[%s2928_s6 + $0x1c0] sm:$0xff]  ;;  %v162_v9 = vld [vmem:[%s2928_s6 + $0x128] sm:$0xff] }
  0x2f   :  { %1741 = vmatpush3.xpose.msk.msra.mxu1 %vm41_vm0, %v129_v38  ;;  %1773 = vmatprep.subr.mxu0 %v2051_v2  ;;  %v180_v10 = vld [vmem:[%s2928_s6 + $0x1b8] sm:$0xff]  ;;  %v161_v11 = vld [vmem:[%s2928_s6 + $0x120] sm:$0xff]  ;;  %v179_v12 = vld [vmem:[%s2928_s6 + $0x1b0] sm:$0xff] }
  0x30   :  { %1742 = vmatprep.subr.mxu1 %v2051_v2  ;;  %v160_v13 = vld [vmem:[%s2928_s6 + $0x118] sm:$0xff]  ;;  %v178_v14 = vld [vmem:[%s2928_s6 + $0x1a8] sm:$0xff]  ;;  %v159_v15 = vld [vmem:[%s2928_s6 + $0x110] sm:$0xff] }
  0x31   :  { %v177_v16 = vld [vmem:[%s2928_s6 + $0x1a0] sm:$0xff]  ;;  %v158_v17 = vld [vmem:[%s2928_s6 + $0x108] sm:$0xff]  ;;  %v176_v18 = vld [vmem:[%s2928_s6 + $0x198] sm:$0xff] }
  0x32   :  { %1774 = vmatpush3.xpose.msk.msra.mxu0 %vm41_vm0, %v146_v41  ;;  %v157_v19 = vld [vmem:[%s2928_s6 + $0x100] sm:$0xff]  ;;  %v175_v20 = vld [vmem:[%s2928_s6 + $0x190] sm:$0xff]  ;;  %v174_v22 = vld [vmem:[%s2928_s6 + $0x188] sm:$0xff] }
  0x33   :  { %1743 = vmatpush3.xpose.msk.msra.mxu1 %vm41_vm0, %v128_v40  ;;  %1775 = vmatprep.subr.mxu0 %v2051_v2  ;;  %v119_v21 = vld [vmem:[%s2923_s1 + $0x2] sm:$0x1]  ;;  %v204_v23 = vld [vmem:[%s2928_s6 + $0x278] sm:$0xff]  ;;  %v203_v25 = vld [vmem:[%s2928_s6 + $0x270] sm:$0xff] }
  0x34   :  { %1744 = vmatprep.subr.mxu1 %v2051_v2  ;;  %v173_v24 = vld [vmem:[%s2928_s6 + $0x180] sm:$0xff]  ;;  %v202_v27 = vld [vmem:[%s2928_s6 + $0x268] sm:$0xff]  ;;  %v220_v28 = vld [vmem:[%s2928_s6 + $0x2f8] sm:$0xff] }
  0x35   :  { %v120_v26 = vld [vmem:[%s2923_s1 + $0x3] sm:$0x1]  ;;  %v219_v30 = vld [vmem:[%s2928_s6 + $0x2f0] sm:$0xff]  ;;  %v200_v31 = vld [vmem:[%s2928_s6 + $0x258] sm:$0xff] }
  0x36   :  { %1776 = vmatpush3.xpose.msk.msra.mxu0 %vm41_vm0, %v145_v43  ;;  %v201_v29 = vld [vmem:[%s2928_s6 + $0x260] sm:$0xff]  ;;  %v218_v32 = vld [vmem:[%s2928_s6 + $0x2e8] sm:$0xff]  ;;  %v199_v37 = vld [vmem:[%s2928_s6 + $0x250] sm:$0xff] }
  0x37   :  { %1745 = vmatpush3.xpose.msk.msra.mxu1 %vm41_vm0, %v127_v42  ;;  %1777 = vmatprep.subr.mxu0 %v2051_v2  ;;  %v1315_v33 = vld [vmem:[%s2926_s4 + $0x4] sm:$0x1]  ;;  %v1316_v34 = vld [vmem:[%s2926_s4 + $0x5] sm:$0x1]  ;;  %v1318_v35 = vld [vmem:[%s2926_s4 + $0x7] sm:$0x1] }
  0x38   :  { %1746 = vmatprep.subr.mxu1 %v2051_v2  ;;  %1348 = vperm.xlu1 %2006, %v1315_v33   ;;  %v1317_v36 = vld [vmem:[%s2926_s4 + $0x6] sm:$0x1]  ;;  %v198_v39 = vld [vmem:[%s2928_s6 + $0x248] sm:$0xff]  ;;  %v216_v40 = vld [vmem:[%s2928_s6 + $0x2d8] sm:$0xff] }
  0x39   :  { %1355 = vperm.xlu0 %2005, %v1316_v34   ;;  %v217_v38 = vld [vmem:[%s2928_s6 + $0x2e0] sm:$0xff]  ;;  %v215_v42 = vld [vmem:[%s2928_s6 + $0x2d0] sm:$0xff]  ;;  %v196_v43 = vld [vmem:[%s2928_s6 + $0x238] sm:$0xff] }
  0x3a   :  { %1778 = vmatpush3.xpose.msk.msra.mxu0 %vm41_vm0, %v144_v45  ;;  %v197_v41 = vld [vmem:[%s2928_s6 + $0x240] sm:$0xff]  ;;  %v195_v45 = vld [vmem:[%s2928_s6 + $0x230] sm:$0xff]  ;;  %v208_v58 = vld [vmem:[%s2928_s6 + $0x298] sm:$0xff] }
  0x3b   :  { %1747 = vmatpush3.xpose.msk.msra.mxu1 %vm41_vm0, %v126_v44  ;;  %1779 = vmatprep.subr.mxu0 %v2051_v2  ;;  %v214_v44 = vld [vmem:[%s2928_s6 + $0x2c8] sm:$0xff]  ;;  %v189_v59 = vld [vmem:[%s2928_s6 + $0x200] sm:$0xff]  ;;  %v224_v33 = vld [vmem:[%s2928_s6 + $0x318] sm:$0xff] }
  0x3c   :  { %1748 = vmatprep.subr.mxu1 %v2051_v2  ;;  %1362 = vperm.xlu1 %2006, %v1317_v36   ;;  %v242_v34 = vld [vmem:[%s2928_s6 + $0x3a8] sm:$0xff]  ;;  %v266_v36 = vlaneseq }
  0x3d   :  { %1369 = vperm.xlu0 %2005, %v1318_v35  }
  0x3e   :  { %1780 = vmatpush3.xpose.msk.msra.mxu0 %vm41_vm0, %v143_v47  ;;  %v194_v47 = vld [vmem:[%s2928_s6 + $0x228] sm:$0xff] }
  0x3f   :  { %1749 = vmatpush3.xpose.msk.msra.mxu1 %vm41_vm0, %v125_v46  ;;  %1781 = vmatprep.subr.mxu0 %v2051_v2  ;;  %v213_v46 = vld [vmem:[%s2928_s6 + $0x2c0] sm:$0xff] }
  0x40   :  { %1788 = vmatprep.subr.mxu1 %v2051_v2 }
  0x42   :  { %1751 = vmatmul.mubr.msk.f32.vlgmr.msra.gmra.mxu1 %vm41_vm0, %v117_v48  ;;  %1782 = vmatpush3.xpose.msk.msra.mxu0 %vm41_vm0, %v142_v49  ;;  %v212_v48 = vld [vmem:[%s2928_s6 + $0x2b8] sm:$0xff]  ;;  %v193_v49 = vld [vmem:[%s2928_s6 + $0x220] sm:$0xff] }
  0x43   :  { %1789 = vmatpush3.xpose.msk.msra.mxu1 %vm41_vm0, %v172_v50  ;;  %1783 = vmatprep.subr.mxu0 %v2051_v2  ;;  %v211_v50 = vld [vmem:[%s2928_s6 + $0x2b0] sm:$0xff] }
  0x44   :  { %1790 = vmatprep.subr.mxu1 %v2051_v2  ;;  %1820 = vmatprep.mubr.msk.f32.mxu1 %vm2052_vm1, %v2051_v2 }
  0x46   :  { %1784 = vmatpush3.xpose.msk.msra.mxu0 %vm41_vm0, %v141_v51  ;;  %v192_v51 = vld [vmem:[%s2928_s6 + $0x218] sm:$0xff] }
  0x47   :  { %1791 = vmatpush3.xpose.msk.msra.mxu1 %vm41_vm0, %v171_v52  ;;  %1823 = vmatprep.subr.mxu0 %v2051_v2  ;;  %v210_v52 = vld [vmem:[%s2928_s6 + $0x2a8] sm:$0xff] }
  0x48   :  { %1792 = vmatprep.subr.mxu1 %v2051_v2 }
  0x49   :  { %1786 = vmatmul.mubr.msk.f32.vlgmr.msra.gmra.mxu0 %vm41_vm0, %v118_v53 }
  0x4a   :  { %1824 = vmatpush3.xpose.msk.msra.mxu0 %vm41_vm0, %v188_v55  ;;  %1855 = vmatprep.mubr.msk.f32.mxu0 %vm2052_vm1, %v2051_v2  ;;  %v209_v55 = vld [vmem:[%s2928_s6 + $0x2a0] sm:$0xff] }
  0x4b   :  { %1793 = vmatpush3.xpose.msk.msra.mxu1 %vm41_vm0, %v170_v54  ;;  %1825 = vmatprep.subr.mxu0 %v2051_v2  ;;  %v191_v54 = vld [vmem:[%s2928_s6 + $0x210] sm:$0xff] }
  0x4c   :  { %1794 = vmatprep.subr.mxu1 %v2051_v2 }
  0x4e   :  { %1826 = vmatpush3.xpose.msk.msra.mxu0 %vm41_vm0, %v187_v57  ;;  %v190_v57 = vld [vmem:[%s2928_s6 + $0x208] sm:$0xff] }
  0x4f   :  { %1795 = vmatpush3.xpose.msk.msra.mxu1 %vm41_vm0, %v169_v56  ;;  %1827 = vmatprep.subr.mxu0 %v2051_v2 }
  0x50   :  { %1796 = vmatprep.subr.mxu1 %v2051_v2 }
  0x52   :  { %1828 = vmatpush3.xpose.msk.msra.mxu0 %vm41_vm0, %v186_v61 }
  0x53   :  { %1797 = vmatpush3.xpose.msk.msra.mxu1 %vm41_vm0, %v168_v60  ;;  %1829 = vmatprep.subr.mxu0 %v2051_v2  ;;  %v207_v60 = vld [vmem:[%s2928_s6 + $0x290] sm:$0xff] }
  0x54   :  { %1798 = vmatprep.subr.mxu1 %v2051_v2 }
  0x56   :  { %1830 = vmatpush3.xpose.msk.msra.mxu0 %vm41_vm0, %v185_v63  ;;  %v236_v63 = vld [vmem:[%s2928_s6 + $0x378] sm:$0xff] }
  0x57   :  { %1799 = vmatpush3.xpose.msk.msra.mxu1 %vm41_vm0, %v167_v62  ;;  %1831 = vmatprep.subr.mxu0 %v2051_v2  ;;  %v121_v62 = vld [vmem:[%s2923_s1 + $0x4] sm:$0x1] }
  0x58   :  { %1800 = vmatprep.subr.mxu1 %v2051_v2 }
  0x5a   :  { %1832 = vmatpush3.xpose.msk.msra.mxu0 %vm41_vm0, %v184_v1 }
  0x5b   :  { %1801 = vmatpush3.xpose.msk.msra.mxu1 %vm41_vm0, %v166_v0  ;;  %1833 = vmatprep.subr.mxu0 %v2051_v2  ;;  %v206_v0 = vld [vmem:[%s2928_s6 + $0x288] sm:$0xff] }
  0x5c   :  { %1802 = vmatprep.subr.mxu1 %v2051_v2 }
  0x5e   :  { %1834 = vmatpush3.xpose.msk.msra.mxu0 %vm41_vm0, %v183_v4  ;;  %v205_v4 = vld [vmem:[%s2928_s6 + $0x280] sm:$0xff] }
  0x5f   :  { %1803 = vmatpush3.xpose.msk.msra.mxu1 %vm41_vm0, %v165_v3  ;;  %1835 = vmatprep.subr.mxu0 %v2051_v2  ;;  %v235_v3 = vld [vmem:[%s2928_s6 + $0x370] sm:$0xff] }
  0x60   :  { %1804 = vmatprep.subr.mxu1 %v2051_v2 }
  0x62   :  { %1836 = vmatpush3.xpose.msk.msra.mxu0 %vm41_vm0, %v182_v6  ;;  %v234_v6 = vld [vmem:[%s2928_s6 + $0x368] sm:$0xff] }
  0x63   :  { %1805 = vmatpush3.xpose.msk.msra.mxu1 %vm41_vm0, %v164_v5  ;;  %1837 = vmatprep.subr.mxu0 %v2051_v2  ;;  %v122_v5 = vld [vmem:[%s2923_s1 + $0x5] sm:$0x1] }
  0x64   :  { %1806 = vmatprep.subr.mxu1 %v2051_v2 }
  0x66   :  { %1838 = vmatpush3.xpose.msk.msra.mxu0 %vm41_vm0, %v181_v8  ;;  %v252_v8 = vld [vmem:[%s2928_s6 + $0x3f8] sm:$0xff] }
  0x67   :  { %1807 = vmatpush3.xpose.msk.msra.mxu1 %vm41_vm0, %v163_v7  ;;  %1839 = vmatprep.subr.mxu0 %v2051_v2 }
  0x68   :  { %1808 = vmatprep.subr.mxu1 %v2051_v2 }
  0x6a   :  { %1840 = vmatpush3.xpose.msk.msra.mxu0 %vm41_vm0, %v180_v10 }
  0x6b   :  { %1809 = vmatpush3.xpose.msk.msra.mxu1 %vm41_vm0, %v162_v9  ;;  %1841 = vmatprep.subr.mxu0 %v2051_v2 }
  0x6c   :  { %1810 = vmatprep.subr.mxu1 %v2051_v2 }
  0x6e   :  { %1842 = vmatpush3.xpose.msk.msra.mxu0 %vm41_vm0, %v179_v12  ;;  %v233_v12 = vld [vmem:[%s2928_s6 + $0x360] sm:$0xff] }
  0x6f   :  { %1811 = vmatpush3.xpose.msk.msra.mxu1 %vm41_vm0, %v161_v11  ;;  %1843 = vmatprep.subr.mxu0 %v2051_v2 }
  0x70   :  { %1812 = vmatprep.subr.mxu1 %v2051_v2 }
  0x72   :  { %1844 = vmatpush3.xpose.msk.msra.mxu0 %vm41_vm0, %v178_v14 }
  0x73   :  { %1813 = vmatpush3.xpose.msk.msra.mxu1 %vm41_vm0, %v160_v13  ;;  %1845 = vmatprep.subr.mxu0 %v2051_v2  ;;  %v251_v13 = vld [vmem:[%s2928_s6 + $0x3f0] sm:$0xff] }
  0x74   :  { %1814 = vmatprep.subr.mxu1 %v2051_v2 }
  0x76   :  { %1846 = vmatpush3.xpose.msk.msra.mxu0 %vm41_vm0, %v177_v16  ;;  %v250_v16 = vld [vmem:[%s2928_s6 + $0x3e8] sm:$0xff] }
  0x77   :  { %1815 = vmatpush3.xpose.msk.msra.mxu1 %vm41_vm0, %v159_v15  ;;  %1847 = vmatprep.subr.mxu0 %v2051_v2  ;;  %v232_v15 = vld [vmem:[%s2928_s6 + $0x358] sm:$0xff] }
  0x78   :  { %1816 = vmatprep.subr.mxu1 %v2051_v2 }
  0x7a   :  { %1848 = vmatpush3.xpose.msk.msra.mxu0 %vm41_vm0, %v176_v18  ;;  %v249_v18 = vld [vmem:[%s2928_s6 + $0x3e0] sm:$0xff] }
  0x7b   :  { %1817 = vmatpush3.xpose.msk.msra.mxu1 %vm41_vm0, %v158_v17  ;;  %1849 = vmatprep.subr.mxu0 %v2051_v2  ;;  %v231_v17 = vld [vmem:[%s2928_s6 + $0x350] sm:$0xff] }
  0x7c   :  { %1818 = vmatprep.subr.mxu1 %v2051_v2 }
  0x7e   :  { %1850 = vmatpush3.xpose.msk.msra.mxu0 %vm41_vm0, %v175_v20  ;;  %v248_v20 = vld [vmem:[%s2928_s6 + $0x3d8] sm:$0xff] }
  0x7f   :  { %1819 = vmatpush3.xpose.msk.msra.mxu1 %vm41_vm0, %v157_v19  ;;  %1851 = vmatprep.subr.mxu0 %v2051_v2  ;;  %v230_v19 = vld [vmem:[%s2928_s6 + $0x348] sm:$0xff] }
  0x80   :  { %1858 = vmatprep.subr.mxu1 %v2051_v2 }
  0x82   :  { %1821 = vmatmul.mubr.msk.f32.vlgmr.msra.gmra.mxu1 %vm41_vm0, %v119_v21  ;;  %1852 = vmatpush3.xpose.msk.msra.mxu0 %vm41_vm0, %v174_v22  ;;  %v229_v21 = vld [vmem:[%s2928_s6 + $0x340] sm:$0xff]  ;;  %v247_v22 = vld [vmem:[%s2928_s6 + $0x3d0] sm:$0xff] }
  0x83   :  { %1859 = vmatpush3.xpose.msk.msra.mxu1 %vm41_vm0, %v204_v23  ;;  %1853 = vmatprep.subr.mxu0 %v2051_v2  ;;  %v228_v23 = vld [vmem:[%s2928_s6 + $0x338] sm:$0xff] }
  0x84   :  { %1860 = vmatprep.subr.mxu1 %v2051_v2  ;;  %1890 = vmatprep.mubr.msk.f32.mxu1 %vm2052_vm1, %v2051_v2 }
  0x85   :  { %v2642_v53 = vpop.permute.xlu0 %263 }
  0x86   :  { %1854 = vmatpush3.xpose.msk.msra.mxu0 %vm41_vm0, %v173_v24  ;;  %v246_v24 = vld [vmem:[%s2928_s6 + $0x3c8] sm:$0xff] }
  0x87   :  { %1861 = vmatpush3.xpose.msk.msra.mxu1 %vm41_vm0, %v203_v25  ;;  %1893 = vmatprep.subr.mxu0 %v2051_v2  ;;  %v227_v25 = vld [vmem:[%s2928_s6 + $0x330] sm:$0xff] }
  0x88   :  { %1862 = vmatprep.subr.mxu1 %v2051_v2 }
  0x89   :  { %1856 = vmatmul.mubr.msk.f32.vlgmr.msra.gmra.mxu0 %vm41_vm0, %v120_v26  ;;  %v2654_v56 = vpop.permute.xlu0 %272  ;;  %v245_v26 = vld [vmem:[%s2928_s6 + $0x3c0] sm:$0xff] }
  0x8a   :  { %1894 = vmatpush3.xpose.msk.msra.mxu0 %vm41_vm0, %v220_v28  ;;  %1925 = vmatprep.mubr.msk.f32.mxu0 %vm2052_vm1, %v2051_v2  ;;  %v226_v28 = vld [vmem:[%s2928_s6 + $0x328] sm:$0xff] }
  0x8b   :  { %1863 = vmatpush3.xpose.msk.msra.mxu1 %vm41_vm0, %v202_v27  ;;  %1895 = vmatprep.subr.mxu0 %v2051_v2  ;;  %v2792_v27 = vpop.permute.xlu1 %281 }
  0x8c   :  { %1864 = vmatprep.subr.mxu1 %v2051_v2 }
  0x8d   :  { %v2676_v61 = vpop.permute.xlu0 %299 }
  0x8e   :  { %1896 = vmatpush3.xpose.msk.msra.mxu0 %vm41_vm0, %v219_v30 }
  0x8f   :  { %1865 = vmatpush3.xpose.msk.msra.mxu1 %vm41_vm0, %v201_v29  ;;  %1897 = vmatprep.subr.mxu0 %v2051_v2  ;;  %v244_v29 = vld [vmem:[%s2928_s6 + $0x3b8] sm:$0xff]  ;;  %v2806_v30 = vpop.permute.xlu1 %290 }
  0x90   :  { %1866 = vmatprep.subr.mxu1 %v2051_v2 }
  0x91   :  { %v2692_v1 = vpop.permute.xlu0 %317 }
  0x92   :  { %1898 = vmatpush3.xpose.msk.msra.mxu0 %vm41_vm0, %v218_v32  ;;  %v243_v32 = vld [vmem:[%s2928_s6 + $0x3b0] sm:$0xff] }
  0x93   :  { %1867 = vmatpush3.xpose.msk.msra.mxu1 %vm41_vm0, %v200_v31  ;;  %1899 = vmatprep.subr.mxu0 %v2051_v2  ;;  %v225_v31 = vld [vmem:[%s2928_s6 + $0x320] sm:$0xff]  ;;  %v2826_v35 = vpop.permute.xlu1 %308 }
  0x94   :  { %1868 = vmatprep.subr.mxu1 %v2051_v2 }
  0x95   :  { %v39_v7 = vpop.permute.xlu0 %38 }
  0x96   :  { %1900 = vmatpush3.xpose.msk.msra.mxu0 %vm41_vm0, %v217_v38  ;;  %v241_v38 = vld [vmem:[%s2928_s6 + $0x3a0] sm:$0xff] }
  0x97   :  { %1869 = vmatpush3.xpose.msk.msra.mxu1 %vm41_vm0, %v199_v37  ;;  %1901 = vmatprep.subr.mxu0 %v2051_v2  ;;  %v223_v37 = vld [vmem:[%s2928_s6 + $0x310] sm:$0xff] }
  0x98   :  { %1870 = vmatprep.subr.mxu1 %v2051_v2 }
  0x9a   :  { %1902 = vmatpush3.xpose.msk.msra.mxu0 %vm41_vm0, %v216_v40 }
  0x9b   :  { %1871 = vmatpush3.xpose.msk.msra.mxu1 %vm41_vm0, %v198_v39  ;;  %1903 = vmatprep.subr.mxu0 %v2051_v2  ;;  %v267_v39 = vshrl.u32 %v266_v36, 7 }
  0x9c   :  { %1872 = vmatprep.subr.mxu1 %v2051_v2 }
  0x9d   :  { %v2840_v40 = vpop.permute.xlu1 %326 }
  0x9e   :  { %1904 = vmatpush3.xpose.msk.msra.mxu0 %vm41_vm0, %v215_v42  ;;  %v240_v42 = vld [vmem:[%s2928_s6 + $0x398] sm:$0xff] }
  0x9f   :  { %1873 = vmatpush3.xpose.msk.msra.mxu1 %vm41_vm0, %v197_v41  ;;  %1905 = vmatprep.subr.mxu0 %v2051_v2  ;;  %v222_v41 = vld [vmem:[%s2928_s6 + $0x308] sm:$0xff] }
  0xa0   :  { %1874 = vmatprep.subr.mxu1 %v2051_v2 }
  0xa2   :  { %1906 = vmatpush3.xpose.msk.msra.mxu0 %vm41_vm0, %v214_v44  ;;  %v221_v44 = vld [vmem:[%s2928_s6 + $0x300] sm:$0xff] }
  0xa3   :  { %1875 = vmatpush3.xpose.msk.msra.mxu1 %vm41_vm0, %v196_v43  ;;  %1907 = vmatprep.subr.mxu0 %v2051_v2  ;;  %v2850_v43 = vsub.s32 0, %v267_v39 }
  0xa4   :  { %1876 = vmatprep.subr.mxu1 %v2051_v2 }
  0xa6   :  { %1908 = vmatpush3.xpose.msk.msra.mxu0 %vm41_vm0, %v213_v46  ;;  %v1321_v46 = vpop.permute.xlu1 %1320 }
  0xa7   :  { %1877 = vmatpush3.xpose.msk.msra.mxu1 %vm41_vm0, %v195_v45  ;;  %1909 = vmatprep.subr.mxu0 %v2051_v2  ;;  %v239_v45 = vld [vmem:[%s2928_s6 + $0x390] sm:$0xff] }
  0xa8   :  { %1878 = vmatprep.subr.mxu1 %v2051_v2 }
  0xaa   :  { %1910 = vmatpush3.xpose.msk.msra.mxu0 %vm41_vm0, %v212_v48  ;;  %v123_v48 = vld [vmem:[%s2923_s1 + $0x6] sm:$0x1] }
  0xab   :  { %1879 = vmatpush3.xpose.msk.msra.mxu1 %vm41_vm0, %v194_v47  ;;  %1911 = vmatprep.subr.mxu0 %v2051_v2  ;;  %v269_v47 = vrot.slane %v2642_v53, %v2850_v43 }
  0xac   :  { %1880 = vmatprep.subr.mxu1 %v2051_v2 }
  0xae   :  { %1912 = vmatpush3.xpose.msk.msra.mxu0 %vm41_vm0, %v211_v50  ;;  %v2873_v50 = vand.u32 127, %v266_v36 }
  0xaf   :  { %1881 = vmatpush3.xpose.msk.msra.mxu1 %vm41_vm0, %v193_v49  ;;  %1913 = vmatprep.subr.mxu0 %v2051_v2  ;;  %v238_v49 = vld [vmem:[%s2928_s6 + $0x388] sm:$0xff] }
  0xb0   :  { %1882 = vmatprep.subr.mxu1 %v2051_v2 }
  0xb2   :  { %1914 = vmatpush3.xpose.msk.msra.mxu0 %vm41_vm0, %v210_v52 }
  0xb3   :  { %1883 = vmatpush3.xpose.msk.msra.mxu1 %vm41_vm0, %v192_v51  ;;  %1915 = vmatprep.subr.mxu0 %v2051_v2  ;;  %v1325_v51 = vrot.slane %v1321_v46, %v2850_v43 }
  0xb4   :  { %1884 = vmatprep.subr.mxu1 %v2051_v2 }
  0xb5   :  { %vm1375_vm2 = vcmp.ge.s32.totalorder %v2873_v50, %v1325_v51 }
  0xb6   :  { %1916 = vmatpush3.xpose.msk.msra.mxu0 %vm41_vm0, %v209_v55 }
  0xb7   :  { %1885 = vmatpush3.xpose.msk.msra.mxu1 %vm41_vm0, %v191_v54  ;;  %1917 = vmatprep.subr.mxu0 %v2051_v2  ;;  %v237_v54 = vld [vmem:[%s2928_s6 + $0x380] sm:$0xff] }
  0xb8   :  { %1886 = vmatprep.subr.mxu1 %v2051_v2 }
  0xba   :  { %1918 = vmatpush3.xpose.msk.msra.mxu0 %vm41_vm0, %v208_v58  ;;  %v1328_v58 = vpop.permute.xlu0 %1327 }
  0xbb   :  { %1887 = vmatpush3.xpose.msk.msra.mxu1 %vm41_vm0, %v190_v57  ;;  %1919 = vmatprep.subr.mxu0 %v2051_v2 }
  0xbc   :  { %1888 = vmatprep.subr.mxu1 %v2051_v2 }
  0xbe   :  { %1920 = vmatpush3.xpose.msk.msra.mxu0 %vm41_vm0, %v207_v60  ;;  %v124_v60 = vld [vmem:[%s2923_s1 + $0x7] sm:$0x1]  ;;  %s2054_s1 = smov [#allocation2]  }
  0xbf   :  { %1889 = vmatpush3.xpose.msk.msra.mxu1 %vm41_vm0, %v189_v59  ;;  %1921 = vmatprep.subr.mxu0 %v2051_v2  ;;  %v278_v59 = vrot.slane %v2654_v56, %v2850_v43  ;;  %v1335_v56 = vpop.permute.xlu1 %1334  ;;  %s1405_s6 = sshll.u32 %s2054_s1, 4  ;;  %s1406_s6 = int_to_ptr.vmem [resolvable:$true] %s1405_s6 }
  0xc0   :  { %1928 = vmatprep.subr.mxu1 %v2051_v2  ;;  %s2007_s30 = scalar_lea.vmem %s1406_s6, 128  ;;  %p2012_p1 = scmp.lt.s32.totalorder %s1406_s6, %s1406_s6 }
  0xc1   :  { %p2008_p0 = scmp.ne.s32.totalorder %s1406_s6, %s2007_s30  ;;  %p2013_p2 = scmp.lt.s32.totalorder %s2007_s30, %s2007_s30 }
  0xc2   :  { %1891 = vmatmul.mubr.msk.f32.vlgmr.msra.gmra.mxu1 %vm41_vm0, %v121_v62  ;;  %1922 = vmatpush3.xpose.msk.msra.mxu0 %vm41_vm0, %v206_v0 }
  0xc3   :  { %1929 = vmatpush3.xpose.msk.msra.mxu1 %vm41_vm0, %v236_v63  ;;  %1923 = vmatprep.subr.mxu0 %v2051_v2  ;;  %p2014_p3 = por %p2013_p2, %p2012_p1 }
  0xc4   :  { %1930 = vmatprep.subr.mxu1 %v2051_v2  ;;  %1960 = vmatprep.mubr.msk.f32.mxu1 %vm2052_vm1, %v2051_v2 }
  0xc5   :  { %p2015_p4 = pnand %p2014_p3, %p2008_p0 }
  0xc6   :  { %1924 = vmatpush3.xpose.msk.msra.mxu0 %vm41_vm0, %v205_v4 }
  0xc7   :  { %1931 = vmatpush3.xpose.msk.msra.mxu1 %vm41_vm0, %v235_v3  ;;  %1963 = vmatprep.subr.mxu0 %v2051_v2 }
  0xc8   :  { %1932 = vmatprep.subr.mxu1 %v2051_v2 }
  0xc9   :  { %v111_v9 = vpop.f32.mrf.mxu0  ;;  %1926 = vmatmul.mubr.msk.f32.vlgmr.msra.gmra.mxu0 %vm41_vm0, %v122_v5 }
  0xca   :  { %v112_v10 = vadd.f32 %v111_v9, %v39_v7  ;;  %1964 = vmatpush3.xpose.msk.msra.mxu0 %vm41_vm0, %v252_v8  ;;  %1995 = vmatprep.mubr.msk.f32.mxu0 %vm2052_vm1, %v2051_v2  ;;  %v1339_v7 = vrot.slane %v1335_v56, %v2850_v43 }
  0xcb   :  { %1933 = vmatpush3.xpose.msk.msra.mxu1 %vm41_vm0, %v234_v6  ;;  %v1717_v11 = vpop.f32.mrf.mxu0  ;;  %1965 = vmatprep.subr.mxu0 %v2051_v2  ;;  %v287_v6 = vrot.slane %v2792_v27, %v2850_v43 }
  0xcc   :  { %1934 = vmatprep.subr.mxu1 %v2051_v2  ;;  %v115_v14 = vmax.f32 %v112_v10, 0.0  ;;  %vm1377_vm4 = vcmp.ge.s32.totalorder %v2873_v50, %v1339_v7 }
  0xce   :  { %1966 = vmatpush3.xpose.msk.msra.mxu0 %vm41_vm0, %v251_v13  ;;  %116 = vst [vmem:[#allocation2] sm:$0xff] %v115_v14  ;;  %v296_v13 = vrot.slane %v2806_v30, %v2850_v43 }
  0xcf   :  { %1935 = vmatpush3.xpose.msk.msra.mxu1 %vm41_vm0, %v233_v12  ;;  %1967 = vmatprep.subr.mxu0 %v2051_v2  ;;  %v1342_v12 = vpop.permute.xlu0 %1341 }
  0xd0   :  { %1936 = vmatprep.subr.mxu1 %v2051_v2 }
  0xd2   :  { %1968 = vmatpush3.xpose.msk.msra.mxu0 %vm41_vm0, %v250_v16 }
  0xd3   :  { %1937 = vmatpush3.xpose.msk.msra.mxu1 %vm41_vm0, %v232_v15  ;;  %1969 = vmatprep.subr.mxu0 %v2051_v2  ;;  %v1346_v15 = vrot.slane %v1342_v12, %v2850_v43 }
  0xd4   :  { %1938 = vmatprep.subr.mxu1 %v2051_v2 }
  0xd5   :  { %vm1378_vm5 = vcmp.ge.s32.totalorder %v2873_v50, %v1346_v15 }
  0xd6   :  { %1970 = vmatpush3.xpose.msk.msra.mxu0 %vm41_vm0, %v249_v18 }
  0xd7   :  { %1939 = vmatpush3.xpose.msk.msra.mxu1 %vm41_vm0, %v231_v17  ;;  %1971 = vmatprep.subr.mxu0 %v2051_v2 }
  0xd8   :  { %1940 = vmatprep.subr.mxu1 %v2051_v2 }
  0xda   :  { %1972 = vmatpush3.xpose.msk.msra.mxu0 %vm41_vm0, %v248_v20 }
  0xdb   :  { %1941 = vmatpush3.xpose.msk.msra.mxu1 %vm41_vm0, %v230_v19  ;;  %1973 = vmatprep.subr.mxu0 %v2051_v2 }
  0xdc   :  { %1942 = vmatprep.subr.mxu1 %v2051_v2 }
  0xde   :  { %1974 = vmatpush3.xpose.msk.msra.mxu0 %vm41_vm0, %v247_v22 }
  0xdf   :  { %1943 = vmatpush3.xpose.msk.msra.mxu1 %vm41_vm0, %v229_v21  ;;  %1975 = vmatprep.subr.mxu0 %v2051_v2 }
  0xe0   :  { %1944 = vmatprep.subr.mxu1 %v2051_v2 }
  0xe2   :  { %1976 = vmatpush3.xpose.msk.msra.mxu0 %vm41_vm0, %v246_v24 }
  0xe3   :  { %1945 = vmatpush3.xpose.msk.msra.mxu1 %vm41_vm0, %v228_v23  ;;  %1977 = vmatprep.subr.mxu0 %v2051_v2 }
  0xe4   :  { %1946 = vmatprep.subr.mxu1 %v2051_v2 }
  0xe6   :  { %1978 = vmatpush3.xpose.msk.msra.mxu0 %vm41_vm0, %v245_v26 }
  0xe7   :  { %1947 = vmatpush3.xpose.msk.msra.mxu1 %vm41_vm0, %v227_v25  ;;  %1979 = vmatprep.subr.mxu0 %v2051_v2 }
  0xe8   :  { %1948 = vmatprep.subr.mxu1 %v2051_v2 }
  0xea   :  { %1980 = vmatpush3.xpose.msk.msra.mxu0 %vm41_vm0, %v244_v29 }
  0xeb   :  { %1949 = vmatpush3.xpose.msk.msra.mxu1 %vm41_vm0, %v226_v28  ;;  %1981 = vmatprep.subr.mxu0 %v2051_v2 }
  0xec   :  { %1950 = vmatprep.subr.mxu1 %v2051_v2 }
  0xee   :  { %1982 = vmatpush3.xpose.msk.msra.mxu0 %vm41_vm0, %v243_v32 }
  0xef   :  { %1951 = vmatpush3.xpose.msk.msra.mxu1 %vm41_vm0, %v225_v31  ;;  %1983 = vmatprep.subr.mxu0 %v2051_v2 }
  0xf0   :  { %1952 = vmatprep.subr.mxu1 %v2051_v2 }
  0xf2   :  { %1984 = vmatpush3.xpose.msk.msra.mxu0 %vm41_vm0, %v242_v34 }
  0xf3   :  { %1953 = vmatpush3.xpose.msk.msra.mxu1 %vm41_vm0, %v224_v33  ;;  %1985 = vmatprep.subr.mxu0 %v2051_v2 }
  0xf4   :  { %1954 = vmatprep.subr.mxu1 %v2051_v2 }
  0xf6   :  { %1986 = vmatpush3.xpose.msk.msra.mxu0 %vm41_vm0, %v241_v38 }
  0xf7   :  { %1955 = vmatpush3.xpose.msk.msra.mxu1 %vm41_vm0, %v223_v37  ;;  %1987 = vmatprep.subr.mxu0 %v2051_v2 }
  0xf8   :  { %1956 = vmatprep.subr.mxu1 %v2051_v2 }
  0xfa   :  { %1988 = vmatpush3.xpose.msk.msra.mxu0 %vm41_vm0, %v240_v42 }
  0xfb   :  { %1957 = vmatpush3.xpose.msk.msra.mxu1 %vm41_vm0, %v222_v41  ;;  %1989 = vmatprep.subr.mxu0 %v2051_v2 }
  0xfc   :  { %1958 = vmatprep.subr.mxu1 %v2051_v2 }
  0xfe   :  { %1990 = vmatpush3.xpose.msk.msra.mxu0 %vm41_vm0, %v239_v45 }
  0xff   :  { %1959 = vmatpush3.xpose.msk.msra.mxu1 %vm41_vm0, %v221_v44  ;;  %1991 = vmatprep.subr.mxu0 %v2051_v2 }
 0x102   :  { %1961 = vmatmul.mubr.msk.f32.vlgmr.msra.gmra.mxu1 %vm41_vm0, %v123_v48  ;;  %v450_v52 = vpop.f32.mrf.mxu1  ;;  %1992 = vmatpush3.xpose.msk.msra.mxu0 %vm41_vm0, %v238_v49 }
 0x103   :  { %v451_v53 = vadd.f32 %v450_v52, %v269_v47  ;;  %1993 = vmatprep.subr.mxu0 %v2051_v2  ;;  %v1332_v2 = vrot.slane %v1328_v58, %v2850_v43 }
 0x104   :  { %v1752_v55 = vpop.f32.mrf.mxu1 }
 0x105   :  { %v1301_v57 = vmax.f32 %v451_v53, 0.0  ;;  %vm1376_vm3 = vcmp.ge.s32.totalorder %v2873_v50, %v1332_v2 }
 0x106   :  { %1994 = vmatpush3.xpose.msk.msra.mxu0 %vm41_vm0, %v237_v54 }
 0x107   :  { %v1383_v62 = vsel %vm1375_vm2, 0.0, %v1301_v57 }
 0x108   :  { %1391 = vst [vmem:[#allocation4] sm:$0x1] %v1383_v62 }
 0x109   :  { %v571_v63 = vpop.f32.mrf.mxu0  ;;  %1996 = vmatmul.mubr.msk.f32.vlgmr.msra.gmra.mxu0 %vm41_vm0, %v124_v60 }
 0x10a   :  { %v572_v0 = vadd.f32 %v571_v63, %v278_v59 }
 0x10b   :  { %v1787_v3 = vpop.f32.mrf.mxu0 }
 0x10c   :  { %v1302_v4 = vmax.f32 %v572_v0, 0.0 }
 0x10e   :  { %v1384_v5 = vsel %vm1376_vm3, 0.0, %v1302_v4 }
 0x10f   :  { %1392 = vst [vmem:[#allocation4 + $0x1] sm:$0x1] %v1384_v5 }
 0x142   :  { %v692_v8 = vpop.f32.mrf.mxu1 }
 0x143   :  { %v693_v9 = vadd.f32 %v692_v8, %v287_v6 }
 0x144   :  { %v1822_v10 = vpop.f32.mrf.mxu1 }
 0x145   :  { %v1303_v11 = vmax.f32 %v693_v9, 0.0 }
 0x147   :  { %v1385_v14 = vsel %vm1377_vm4, 0.0, %v1303_v11 }
 0x148   :  { %1393 = vst [vmem:[#allocation4 + $0x2] sm:$0x1] %v1385_v14 }
 0x149   :  { %v813_v16 = vpop.f32.mrf.mxu0 }
 0x14a   :  { %v814_v17 = vadd.f32 %v813_v16, %v296_v13 }
 0x14b   :  { %v1857_v18 = vpop.f32.mrf.mxu0 }
 0x14c   :  { %v1304_v19 = vmax.f32 %v814_v17, 0.0 }
 0x14e   :  { %v1386_v20 = vsel %vm1378_vm5, 0.0, %v1304_v19 }
 0x14f   :  { %1394 = vst [vmem:[#allocation4 + $0x3] sm:$0x1] %v1386_v20 }
 0x150   :  { %2018 = shalt.err (!%p2015_p4)
}
 0x151   :  { %1408 = dma.vmem_to_hbm [thread:$0]  %s1406_s6, 128, %s2929_s7, [#allocation3]   ;;  %v1349_v21 = vpop.permute.xlu1 %1348  ;;  %v305_v22 = vrot.slane %v2676_v61, %v2850_v43  ;;  %v1356_v28 = vpop.permute.xlu0 %1355  ;;  %v314_v29 = vrot.slane %v2826_v35, %v2850_v43  ;;  %v323_v38 = vrot.slane %v2692_v1, %v2850_v43  ;;  %v332_v47 = vrot.slane %v2840_v40, %v2850_v43 }
 0x152   :  { %v1353_v23 = vrot.slane %v1349_v21, %v2850_v43  ;;  %v1360_v31 = vrot.slane %v1356_v28, %v2850_v43  ;;  %s2055_s7 = smov [#allocation4]  }
 0x153   :  { %s1414_s10 = sshll.u32 %s2055_s7, 4  ;;  %s1415_s10 = int_to_ptr.vmem [resolvable:$true] %s1414_s10 }
 0x154   :  { %vm1379_vm6 = vcmp.ge.s32.totalorder %v2873_v50, %v1353_v23  ;;  %vm1380_vm7 = vcmp.ge.s32.totalorder %v2873_v50, %v1360_v31  ;;  %s2027_s11 = scalar_lea.vmem %s1415_s10, 128  ;;  %p2032_p6 = scmp.lt.s32.totalorder %s1415_s10, %s1415_s10 }
 0x155   :  { %v1363_v37 = vpop.permute.xlu1 %1362  ;;  %v1370_v45 = vpop.permute.xlu0 %1369  ;;  %p2028_p5 = scmp.ne.s32.totalorder %s1415_s10, %s2027_s11  ;;  %p2033_p7 = scmp.lt.s32.totalorder %s2027_s11, %s2027_s11 }
 0x156   :  { %v1367_v39 = vrot.slane %v1363_v37, %v2850_v43  ;;  %v1374_v48 = vrot.slane %v1370_v45, %v2850_v43 }
 0x157   :  { %p2034_p8 = por %p2033_p7, %p2032_p6 }
 0x158   :  { %vm1381_vm8 = vcmp.ge.s32.totalorder %v2873_v50, %v1367_v39  ;;  %vm1382_vm9 = vcmp.ge.s32.totalorder %v2873_v50, %v1374_v48 }
 0x159   :  { %p2035_p9 = pnand %p2034_p8, %p2028_p5 }
 0x182   :  { %v934_v24 = vpop.f32.mrf.mxu1 }
 0x183   :  { %v935_v25 = vadd.f32 %v934_v24, %v305_v22 }
 0x184   :  { %v1892_v26 = vpop.f32.mrf.mxu1 }
 0x185   :  { %v1305_v27 = vmax.f32 %v935_v25, 0.0 }
 0x187   :  { %v1387_v30 = vsel %vm1379_vm6, 0.0, %v1305_v27 }
 0x188   :  { %1395 = vst [vmem:[#allocation4 + $0x4] sm:$0x1] %v1387_v30 }
 0x189   :  { %v1055_v32 = vpop.f32.mrf.mxu0 }
 0x18a   :  { %v1056_v33 = vadd.f32 %v1055_v32, %v314_v29 }
 0x18b   :  { %v1927_v61 = vpop.f32.mrf.mxu0 }
 0x18c   :  { %v1306_v34 = vmax.f32 %v1056_v33, 0.0 }
 0x18e   :  { %v1388_v36 = vsel %vm1380_vm7, 0.0, %v1306_v34 }
 0x18f   :  { %1396 = vst [vmem:[#allocation4 + $0x5] sm:$0x1] %v1388_v36 }
 0x1c2   :  { %v1176_v41 = vpop.f32.mrf.mxu1 }
 0x1c3   :  { %v1177_v35 = vadd.f32 %v1176_v41, %v323_v38 }
 0x1c4   :  { %v1962_v42 = vpop.f32.mrf.mxu1 }
 0x1c5   :  { %v1307_v44 = vmax.f32 %v1177_v35, 0.0 }
 0x1c7   :  { %v1389_v46 = vsel %vm1381_vm8, 0.0, %v1307_v44 }
 0x1c8   :  { %1397 = vst [vmem:[#allocation4 + $0x6] sm:$0x1] %v1389_v46 }
 0x1c9   :  { %v1297_v49 = vpop.f32.mrf.mxu0 }
 0x1ca   :  { %v1298_v1 = vadd.f32 %v1297_v49, %v332_v47 }
 0x1cb   :  { %v1997_v51 = vpop.f32.mrf.mxu0 }
 0x1cc   :  { %v1308_v52 = vmax.f32 %v1298_v1, 0.0 }
 0x1ce   :  { %v1390_v53 = vsel %vm1382_vm9, 0.0, %v1308_v52 }
 0x1cf   :  { %1398 = vst [vmem:[#allocation4 + $0x7] sm:$0x1] %v1390_v53 }
 0x1d0   :  { %2038 = shalt.err (!%p2035_p9)
}
 0x1d1   :  { %s2056_s12 = smov 16   ;;  %s2057_s13 = smov 1  }
 0x1d2   :  { %1420 = dma.vmem_to_hbm [thread:$0]  %s1415_s10, 128, %s2930_s8, [#allocation5], %s2056_s12, %s2056_s12, %s2057_s13  }
 0x1d3   :  { %2047 = dma.done.wait [#allocation3], 128  }
 0x1d4   :  { %2048 = vsyncadd [#allocation3], 4294967168 }
 0x1d5   :  { %2049 = dma.done.wait [#allocation5], 128  }
 0x1d6   :  { %2050 = vsyncadd [#allocation5], 4294967168 }
 0x1d7   :  { %1427 = vsyncpa [#allocation3], 1 }
 0x1d8   :  { %1428 = vsyncpa [#allocation5], 1 }

</bundles_post_ra>
